<compile_context>
chip_gen: v7x
topology: tpu7x:2x2x1
jax: 0.10.0
libtpu: 0.0.40
codegen_flags: <defaults>
</compile_context>

<pallas_src>
import math

import jax
import jax.numpy as jnp
from jax.experimental import pallas as pl
from jax.experimental.pallas import tpu as pltpu

# ---------------- module config ----------------
CFG = dict(
    emb_dim=32,         # d_in
    d_out=32,
    num_heads=4,
    context_length=4,   # must equal num_heads (head-indexed RoPE broadcast)
)
D_IN = CFG["emb_dim"]
D_OUT = CFG["d_out"]
H = CFG["num_heads"]
HEAD_DIM = D_OUT // H           # 8
HD2 = HEAD_DIM // 2             # 4
NEG_BIG = -1e30                 # safe: diagonal key is always unmasked

assert CFG["context_length"] == H, "apply_rope broadcast requires ctx == num_heads"


# ---------------- small helpers ----------------
def _dot(a, b):
    return jnp.dot(a, b, preferred_element_type=jnp.float32)


def _dot_nt(a, b):
    """a @ b.T without materializing the transpose (MXU handles NT directly)."""
    return jax.lax.dot_general(a, b, (((1,), (1,)), ((), ())),
                               preferred_element_type=jnp.float32)


# ---------------- Pallas kernel ----------------
def _make_kernel(B, S):
    BS = B * S
    # Power-of-2 S lets the same-batch test use a shift instead of an integer
    # divide (which has no cheap VPU lowering).  For general S, pass per-row
    # batch/position id vectors from the host instead.
    assert S & (S - 1) == 0, "toy config assumes power-of-two seq_len"
    s_shift = S.bit_length() - 1

    def kernel(x_ref, wq_ref, wqs_ref, wk_ref, wks_ref, wv_ref,
               wo_ref, bo_ref, cos_ref, sin_ref, o_ref):
        x = x_ref[...]                 # (BS, D_IN), resident in VMEM
        cos = cos_ref[...]             # (BS, D_OUT) full-width rope table
        sin_s = sin_ref[...]           # (BS, D_OUT) sign-folded: [-sin | +sin] per head

        # Causal + same-batch additive bias, built once in-kernel (VPU only).
        # same batch  <=>  r >> log2(S) == c >> log2(S); causal <=> r >= c.
        r = jax.lax.broadcasted_iota(jnp.int32, (BS, BS), 0)
        c = jax.lax.broadcasted_iota(jnp.int32, (BS, BS), 1)
        allowed = jnp.logical_and((r >> s_shift) == (c >> s_shift), r >= c)
        bias = jnp.where(allowed, 0.0, NEG_BIG).astype(jnp.float32)

        # Projections: separate dots per matrix -> no unaligned lane slicing of
        # a packed (BS, 3E) result.  All five dots depend only on x and
        # pipeline back-to-back on the MXU.
        q = _dot(x, wq_ref[...])       # per-head [real|imag] columns, pre-scaled
        qs = _dot(x, wqs_ref[...])     # RoPE partner ([imag|real] columns), pre-scaled
        k = _dot(x, wk_ref[...])
        ks = _dot(x, wks_ref[...])
        v = _dot(x, wv_ref[...])       # original head-major column order

        # Full-width RoPE: rot = t * cos + partner(t) * sign_folded_sin.
        qr = q * cos + qs * sin_s
        kr = k * cos + ks * sin_s

        wo = wo_ref[...]               # (D_OUT, D_OUT) output projection
        out = jnp.zeros((BS, D_OUT), jnp.float32)
        for h in range(H):
            hs = slice(h * HEAD_DIM, (h + 1) * HEAD_DIM)
            # One 8-deep NT dot per head (scale already folded into Wq).
            scores = _dot_nt(qr[:, hs], kr[:, hs]) + bias
            m = jnp.max(scores, axis=-1, keepdims=True)
            p = jnp.exp(scores - m)
            l = jnp.sum(p, axis=-1, keepdims=True)
            # Normalize the small (BS, head_dim) result with an EUP reciprocal
            # instead of dividing the (BS, BS) probabilities.
            pv = _dot(p, v[:, hs]) * pl.reciprocal(l, approx=False)
            # Fold the "concat heads + proj" into per-head row slices of Wo.
            out = out + _dot(pv, wo[hs, :])

        o_ref[...] = (out + bo_ref[...]).astype(o_ref.dtype)

    return kernel


# ---------------- wrapper ----------------
@jax.jit
def rope_attention_forward(x, kp):
    B, S, _ = x.shape
    BS = B * S
    x2 = x.reshape(BS, D_IN).astype(jnp.float32)

    # Advisory cost hint for the XLA scheduler around the custom call.
    flops = int(
        5 * 2 * BS * D_IN * D_OUT                       # q, q_partner, k, k_partner, v
        + H * (2 * BS * BS * HEAD_DIM                   # scores
               + 2 * BS * BS * HEAD_DIM                 # p @ v
               + 2 * BS * HEAD_DIM * D_OUT)             # per-head output proj
        + 12 * BS * D_OUT                               # RoPE FMAs + epilogue (approx)
    )
    transcendentals = int(H * BS * BS + H * BS)         # exp + reciprocal
    bytes_accessed = int(4 * (BS * D_IN + 5 * D_IN * D_OUT + D_OUT * D_OUT
                              + D_OUT + 2 * BS * D_OUT + BS * D_OUT))

    vmem_spec = pl.BlockSpec(memory_space=pltpu.MemorySpace.VMEM)
    out = pl.pallas_call(
        _make_kernel(B, S),
        out_shape=jax.ShapeDtypeStruct((BS, D_OUT), jnp.float32),
        in_specs=[vmem_spec] * 10,
        out_specs=vmem_spec,
        compiler_params=pltpu.CompilerParams(vmem_limit_bytes=16 * 1024 * 1024),
        cost_estimate=pl.CostEstimate(flops=flops, transcendentals=transcendentals,
                                      bytes_accessed=bytes_accessed),
    )(x2, kp["wq"], kp["wqs"], kp["wk"], kp["wks"], kp["wv"],
      kp["wo"], kp["bo"], kp["cos"], kp["sin"])
    return out.reshape(B, S, D_OUT)


# ---------------- params / rope tables / host-side packing ----------------
def init_params(key):
    kq, ko, kb = jax.random.split(key, 3)
    return dict(
        wqkv=jax.random.normal(kq, (D_IN, 3 * D_OUT), jnp.float32) * 0.05,
        wo=jax.random.normal(ko, (D_OUT, D_OUT), jnp.float32) * 0.05,
        bo=jax.random.normal(kb, (D_OUT,), jnp.float32) * 0.05,
    )


def rope_tables():
    """Faithful pre_compute_freq: freq[m, j] = m * theta_j; m is (ab)used as the
    head index by the module's broadcast."""
    theta = 1.0 / (10000.0 ** (2.0 * jnp.arange(HD2, dtype=jnp.float32) / HEAD_DIM))
    m = jnp.arange(CFG["context_length"], dtype=jnp.float32)
    freq = jnp.outer(m, theta)                     # (ctx, HD2); ctx == num_heads
    return jnp.cos(freq), jnp.sin(freq)


def pack_params(params, cos_h, sin_h, BS):
    """One-time host-side weight prep: per-head-contiguous [real|imag] column
    permutation (and the swapped partner permutation), 1/sqrt(head_dim) folded
    into Wq, sign-folded full-row cos/sin tables."""
    wq = params["wqkv"][:, :D_OUT]
    wk = params["wqkv"][:, D_OUT:2 * D_OUT]
    wv = params["wqkv"][:, 2 * D_OUT:]
    scale = 1.0 / math.sqrt(HEAD_DIM)

    perm, perm_sw = [], []
    for h in range(H):
        re = [h * HEAD_DIM + 2 * j for j in range(HD2)]       # even (real) dims
        im = [h * HEAD_DIM + 2 * j + 1 for j in range(HD2)]   # odd (imag) dims
        perm += re + im
        perm_sw += im + re                                     # partner layout
    perm = jnp.array(perm, jnp.int32)
    perm_sw = jnp.array(perm_sw, jnp.int32)

    cos_row = jnp.concatenate([jnp.concatenate([cos_h[h], cos_h[h]]) for h in range(H)])
    sin_row = jnp.concatenate([jnp.concatenate([-sin_h[h], sin_h[h]]) for h in range(H)])

    return dict(
        wq=wq[:, perm] * scale,
        wqs=wq[:, perm_sw] * scale,
        wk=wk[:, perm],
        wks=wk[:, perm_sw],
        wv=wv,
        wo=params["wo"],
        bo=params["bo"].reshape(1, D_OUT),
        cos=jnp.tile(cos_row[None, :], (BS, 1)),
        sin=jnp.tile(sin_row[None, :], (BS, 1)),
    )


# ---------------- pure-JAX reference (mirrors the PyTorch module 1:1) ----------------
def reference_forward(x, params, cos_h, sin_h):
    B, S, _ = x.shape
    wq = params["wqkv"][:, :D_OUT]
    wk = params["wqkv"][:, D_OUT:2 * D_OUT]
    wv = params["wqkv"][:, 2 * D_OUT:]

    def rope(t):                                   # t: (B, H, S, hd)
        te, to = t[..., 0::2], t[..., 1::2]
        c = cos_h[None, :, None, :]                # broadcast over the *head* axis
        s = sin_h[None, :, None, :]
        return jnp.stack([te * c - to * s, te * s + to * c], axis=-1).reshape(t.shape)

    q = (x @ wq).reshape(B, S, H, HEAD_DIM).transpose(0, 2, 1, 3)
    k = (x @ wk).reshape(B, S, H, HEAD_DIM).transpose(0, 2, 1, 3)
    v = (x @ wv).reshape(B, S, H, HEAD_DIM).transpose(0, 2, 1, 3)
    q, k = rope(q), rope(k)
    scores = jnp.einsum("bhqd,bhkd->bhqk", q, k) / math.sqrt(HEAD_DIM)
    mask = jnp.tril(jnp.ones((S, S), bool))
    scores = jnp.where(mask, scores, -jnp.inf)
    attn = jax.nn.softmax(scores, axis=-1)
    ctx = jnp.einsum("bhqk,bhkd->bhqd", attn, v).transpose(0, 2, 1, 3).reshape(B, S, D_OUT)
    return ctx @ params["wo"] + params["bo"]


# ---------------- main ----------------
if __name__ == "__main__":
    key = jax.random.PRNGKey(0)
    kx, kp = jax.random.split(key)

    B, S = 2, 8
    x = jax.random.normal(kx, (B, S, D_IN), jnp.float32)
    params = init_params(kp)
    cos_h, sin_h = rope_tables()
    packed = pack_params(params, cos_h, sin_h, B * S)

    out = rope_attention_forward(x, packed)
    out = jax.block_until_ready(out)

    ref = reference_forward(x, params, cos_h, sin_h)
    assert out.shape == (B, S, D_OUT)
    assert jnp.allclose(out, ref, atol=1e-4, rtol=1e-4), "mismatch vs reference"

    print("KERNEL_OK")
</pallas_src>

<mosaic_0001>
module attributes {stable_mosaic.version = 11 : i64} {
  func.func @kernel(%arg0: memref<16x32xf32, #tpu.memory_space<vmem>>, %arg1: memref<32x32xf32, #tpu.memory_space<vmem>>, %arg2: memref<32x32xf32, #tpu.memory_space<vmem>>, %arg3: memref<32x32xf32, #tpu.memory_space<vmem>>, %arg4: memref<32x32xf32, #tpu.memory_space<vmem>>, %arg5: memref<32x32xf32, #tpu.memory_space<vmem>>, %arg6: memref<32x32xf32, #tpu.memory_space<vmem>>, %arg7: memref<1x32xf32, #tpu.memory_space<vmem>>, %arg8: memref<16x32xf32, #tpu.memory_space<vmem>>, %arg9: memref<16x32xf32, #tpu.memory_space<vmem>>, %arg10: memref<16x32xf32, #tpu.memory_space<vmem>>) attributes {dimension_semantics = [], scalar_prefetch = 0 : i64, scratch_operands = 0 : i64, tpu.core_type = #tpu.core_type<tc>} {
    %c0 = arith.constant 0 : index
    %c0_0 = arith.constant 0 : index
    %0 = vector.load %arg0[%c0, %c0_0] : memref<16x32xf32, #tpu.memory_space<vmem>>, vector<16x32xf32>
    %c0_1 = arith.constant 0 : index
    %c0_2 = arith.constant 0 : index
    %1 = vector.load %arg8[%c0_1, %c0_2] : memref<16x32xf32, #tpu.memory_space<vmem>>, vector<16x32xf32>
    %c0_3 = arith.constant 0 : index
    %c0_4 = arith.constant 0 : index
    %2 = vector.load %arg9[%c0_3, %c0_4] : memref<16x32xf32, #tpu.memory_space<vmem>>, vector<16x32xf32>
    %3 = tpu.iota {dimensions = array<i32: 0>} : vector<16x16xi32>
    %4 = tpu.iota {dimensions = array<i32: 1>} : vector<16x16xi32>
    %c3_i32 = arith.constant 3 : i32
    %5 = vector.broadcast %c3_i32 : i32 to vector<16x16xi32>
    %6 = arith.shrsi %3, %5 : vector<16x16xi32>
    %c3_i32_5 = arith.constant 3 : i32
    %7 = vector.broadcast %c3_i32_5 : i32 to vector<16x16xi32>
    %8 = arith.shrsi %4, %7 : vector<16x16xi32>
    %9 = arith.cmpi eq, %6, %8 : vector<16x16xi32>
    %10 = arith.cmpi sge, %3, %4 : vector<16x16xi32>
    %11 = arith.andi %9, %10 : vector<16x16xi1>
    %cst = arith.constant 0.000000e+00 : f32
    %cst_6 = arith.constant -1.000000e+30 : f32
    %12 = vector.broadcast %cst : f32 to vector<16x16xf32>
    %13 = vector.broadcast %cst_6 : f32 to vector<16x16xf32>
    %14 = arith.select %11, %12, %13 : vector<16x16xi1>, vector<16x16xf32>
    %c0_7 = arith.constant 0 : index
    %c0_8 = arith.constant 0 : index
    %15 = vector.load %arg1[%c0_7, %c0_8] : memref<32x32xf32, #tpu.memory_space<vmem>>, vector<32x32xf32>
    %cst_9 = arith.constant dense<0.000000e+00> : vector<16x32xf32>
    %16 = tpu.matmul %0, %15, %cst_9 {dimension_numbers = #tpu.dot_dimension_numbers<[1], [0], [0], [1], [0, 0, 1, 1], [], []>} : vector<16x32xf32>, vector<32x32xf32>, vector<16x32xf32> -> vector<16x32xf32>
    %c0_10 = arith.constant 0 : index
    %c0_11 = arith.constant 0 : index
    %17 = vector.load %arg2[%c0_10, %c0_11] : memref<32x32xf32, #tpu.memory_space<vmem>>, vector<32x32xf32>
    %cst_12 = arith.constant dense<0.000000e+00> : vector<16x32xf32>
    %18 = tpu.matmul %0, %17, %cst_12 {dimension_numbers = #tpu.dot_dimension_numbers<[1], [0], [0], [1], [0, 0, 1, 1], [], []>} : vector<16x32xf32>, vector<32x32xf32>, vector<16x32xf32> -> vector<16x32xf32>
    %c0_13 = arith.constant 0 : index
    %c0_14 = arith.constant 0 : index
    %19 = vector.load %arg3[%c0_13, %c0_14] : memref<32x32xf32, #tpu.memory_space<vmem>>, vector<32x32xf32>
    %cst_15 = arith.constant dense<0.000000e+00> : vector<16x32xf32>
    %20 = tpu.matmul %0, %19, %cst_15 {dimension_numbers = #tpu.dot_dimension_numbers<[1], [0], [0], [1], [0, 0, 1, 1], [], []>} : vector<16x32xf32>, vector<32x32xf32>, vector<16x32xf32> -> vector<16x32xf32>
    %c0_16 = arith.constant 0 : index
    %c0_17 = arith.constant 0 : index
    %21 = vector.load %arg4[%c0_16, %c0_17] : memref<32x32xf32, #tpu.memory_space<vmem>>, vector<32x32xf32>
    %cst_18 = arith.constant dense<0.000000e+00> : vector<16x32xf32>
    %22 = tpu.matmul %0, %21, %cst_18 {dimension_numbers = #tpu.dot_dimension_numbers<[1], [0], [0], [1], [0, 0, 1, 1], [], []>} : vector<16x32xf32>, vector<32x32xf32>, vector<16x32xf32> -> vector<16x32xf32>
    %c0_19 = arith.constant 0 : index
    %c0_20 = arith.constant 0 : index
    %23 = vector.load %arg5[%c0_19, %c0_20] : memref<32x32xf32, #tpu.memory_space<vmem>>, vector<32x32xf32>
    %cst_21 = arith.constant dense<0.000000e+00> : vector<16x32xf32>
    %24 = tpu.matmul %0, %23, %cst_21 {dimension_numbers = #tpu.dot_dimension_numbers<[1], [0], [0], [1], [0, 0, 1, 1], [], []>} : vector<16x32xf32>, vector<32x32xf32>, vector<16x32xf32> -> vector<16x32xf32>
    %25 = arith.mulf %16, %1 : vector<16x32xf32>
    %26 = arith.mulf %18, %2 : vector<16x32xf32>
    %27 = arith.addf %25, %26 : vector<16x32xf32>
    %28 = arith.mulf %20, %1 : vector<16x32xf32>
    %29 = arith.mulf %22, %2 : vector<16x32xf32>
    %30 = arith.addf %28, %29 : vector<16x32xf32>
    %c0_22 = arith.constant 0 : index
    %c0_23 = arith.constant 0 : index
    %31 = vector.load %arg6[%c0_22, %c0_23] : memref<32x32xf32, #tpu.memory_space<vmem>>, vector<32x32xf32>
    %cst_24 = arith.constant 0.000000e+00 : f32
    %32 = vector.broadcast %cst_24 : f32 to vector<16x32xf32>
    %33 = vector.extract_strided_slice %27 {offsets = [0, 0], sizes = [16, 8], strides = [1, 1]} : vector<16x32xf32> to vector<16x8xf32>
    %34 = vector.extract_strided_slice %30 {offsets = [0, 0], sizes = [16, 8], strides = [1, 1]} : vector<16x32xf32> to vector<16x8xf32>
    %cst_25 = arith.constant dense<0.000000e+00> : vector<16x16xf32>
    %35 = tpu.matmul %33, %34, %cst_25 {dimension_numbers = #tpu.dot_dimension_numbers<[1], [1], [0], [0], [0, 0, 1, 0], [], []>} : vector<16x8xf32>, vector<16x8xf32>, vector<16x16xf32> -> vector<16x16xf32>
    %36 = arith.addf %35, %14 : vector<16x16xf32>
    %cst_26 = arith.constant dense<0xFF800000> : vector<16xf32>
    %37 = vector.multi_reduction <maximumf>, %36, %cst_26 [1] : vector<16x16xf32> to vector<16xf32>
    %38 = vector.shape_cast %37 : vector<16xf32> to vector<16x1xf32>
    %39 = vector.broadcast %38 : vector<16x1xf32> to vector<16x16xf32>
    %40 = arith.subf %36, %39 : vector<16x16xf32>
    %41 = math.exp %40 : vector<16x16xf32>
    %cst_27 = arith.constant dense<0.000000e+00> : vector<16xf32>
    %42 = vector.multi_reduction <add>, %41, %cst_27 [1] : vector<16x16xf32> to vector<16xf32>
    %43 = vector.shape_cast %42 : vector<16xf32> to vector<16x1xf32>
    %44 = vector.extract_strided_slice %24 {offsets = [0, 0], sizes = [16, 8], strides = [1, 1]} : vector<16x32xf32> to vector<16x8xf32>
    %cst_28 = arith.constant dense<0.000000e+00> : vector<16x8xf32>
    %45 = tpu.matmul %41, %44, %cst_28 {dimension_numbers = #tpu.dot_dimension_numbers<[1], [0], [0], [1], [0, 0, 1, 1], [], []>} : vector<16x16xf32>, vector<16x8xf32>, vector<16x8xf32> -> vector<16x8xf32>
    %46 = tpu.reciprocal %43 : vector<16x1xf32> -> vector<16x1xf32>
    %47 = vector.broadcast %46 : vector<16x1xf32> to vector<16x8xf32>
    %48 = arith.mulf %45, %47 : vector<16x8xf32>
    %49 = vector.extract_strided_slice %31 {offsets = [0, 0], sizes = [8, 32], strides = [1, 1]} : vector<32x32xf32> to vector<8x32xf32>
    %cst_29 = arith.constant dense<0.000000e+00> : vector<16x32xf32>
    %50 = tpu.matmul %48, %49, %cst_29 {dimension_numbers = #tpu.dot_dimension_numbers<[1], [0], [0], [1], [0, 0, 1, 1], [], []>} : vector<16x8xf32>, vector<8x32xf32>, vector<16x32xf32> -> vector<16x32xf32>
    %51 = arith.addf %32, %50 : vector<16x32xf32>
    %52 = vector.extract_strided_slice %27 {offsets = [0, 8], sizes = [16, 8], strides = [1, 1]} : vector<16x32xf32> to vector<16x8xf32>
    %53 = vector.extract_strided_slice %30 {offsets = [0, 8], sizes = [16, 8], strides = [1, 1]} : vector<16x32xf32> to vector<16x8xf32>
    %cst_30 = arith.constant dense<0.000000e+00> : vector<16x16xf32>
    %54 = tpu.matmul %52, %53, %cst_30 {dimension_numbers = #tpu.dot_dimension_numbers<[1], [1], [0], [0], [0, 0, 1, 0], [], []>} : vector<16x8xf32>, vector<16x8xf32>, vector<16x16xf32> -> vector<16x16xf32>
    %55 = arith.addf %54, %14 : vector<16x16xf32>
    %cst_31 = arith.constant dense<0xFF800000> : vector<16xf32>
    %56 = vector.multi_reduction <maximumf>, %55, %cst_31 [1] : vector<16x16xf32> to vector<16xf32>
    %57 = vector.shape_cast %56 : vector<16xf32> to vector<16x1xf32>
    %58 = vector.broadcast %57 : vector<16x1xf32> to vector<16x16xf32>
    %59 = arith.subf %55, %58 : vector<16x16xf32>
    %60 = math.exp %59 : vector<16x16xf32>
    %cst_32 = arith.constant dense<0.000000e+00> : vector<16xf32>
    %61 = vector.multi_reduction <add>, %60, %cst_32 [1] : vector<16x16xf32> to vector<16xf32>
    %62 = vector.shape_cast %61 : vector<16xf32> to vector<16x1xf32>
    %63 = vector.extract_strided_slice %24 {offsets = [0, 8], sizes = [16, 8], strides = [1, 1]} : vector<16x32xf32> to vector<16x8xf32>
    %cst_33 = arith.constant dense<0.000000e+00> : vector<16x8xf32>
    %64 = tpu.matmul %60, %63, %cst_33 {dimension_numbers = #tpu.dot_dimension_numbers<[1], [0], [0], [1], [0, 0, 1, 1], [], []>} : vector<16x16xf32>, vector<16x8xf32>, vector<16x8xf32> -> vector<16x8xf32>
    %65 = tpu.reciprocal %62 : vector<16x1xf32> -> vector<16x1xf32>
    %66 = vector.broadcast %65 : vector<16x1xf32> to vector<16x8xf32>
    %67 = arith.mulf %64, %66 : vector<16x8xf32>
    %68 = vector.extract_strided_slice %31 {offsets = [8, 0], sizes = [8, 32], strides = [1, 1]} : vector<32x32xf32> to vector<8x32xf32>
    %cst_34 = arith.constant dense<0.000000e+00> : vector<16x32xf32>
    %69 = tpu.matmul %67, %68, %cst_34 {dimension_numbers = #tpu.dot_dimension_numbers<[1], [0], [0], [1], [0, 0, 1, 1], [], []>} : vector<16x8xf32>, vector<8x32xf32>, vector<16x32xf32> -> vector<16x32xf32>
    %70 = arith.addf %51, %69 : vector<16x32xf32>
    %71 = vector.extract_strided_slice %27 {offsets = [0, 16], sizes = [16, 8], strides = [1, 1]} : vector<16x32xf32> to vector<16x8xf32>
    %72 = vector.extract_strided_slice %30 {offsets = [0, 16], sizes = [16, 8], strides = [1, 1]} : vector<16x32xf32> to vector<16x8xf32>
    %cst_35 = arith.constant dense<0.000000e+00> : vector<16x16xf32>
    %73 = tpu.matmul %71, %72, %cst_35 {dimension_numbers = #tpu.dot_dimension_numbers<[1], [1], [0], [0], [0, 0, 1, 0], [], []>} : vector<16x8xf32>, vector<16x8xf32>, vector<16x16xf32> -> vector<16x16xf32>
    %74 = arith.addf %73, %14 : vector<16x16xf32>
    %cst_36 = arith.constant dense<0xFF800000> : vector<16xf32>
    %75 = vector.multi_reduction <maximumf>, %74, %cst_36 [1] : vector<16x16xf32> to vector<16xf32>
    %76 = vector.shape_cast %75 : vector<16xf32> to vector<16x1xf32>
    %77 = vector.broadcast %76 : vector<16x1xf32> to vector<16x16xf32>
    %78 = arith.subf %74, %77 : vector<16x16xf32>
    %79 = math.exp %78 : vector<16x16xf32>
    %cst_37 = arith.constant dense<0.000000e+00> : vector<16xf32>
    %80 = vector.multi_reduction <add>, %79, %cst_37 [1] : vector<16x16xf32> to vector<16xf32>
    %81 = vector.shape_cast %80 : vector<16xf32> to vector<16x1xf32>
    %82 = vector.extract_strided_slice %24 {offsets = [0, 16], sizes = [16, 8], strides = [1, 1]} : vector<16x32xf32> to vector<16x8xf32>
    %cst_38 = arith.constant dense<0.000000e+00> : vector<16x8xf32>
    %83 = tpu.matmul %79, %82, %cst_38 {dimension_numbers = #tpu.dot_dimension_numbers<[1], [0], [0], [1], [0, 0, 1, 1], [], []>} : vector<16x16xf32>, vector<16x8xf32>, vector<16x8xf32> -> vector<16x8xf32>
    %84 = tpu.reciprocal %81 : vector<16x1xf32> -> vector<16x1xf32>
    %85 = vector.broadcast %84 : vector<16x1xf32> to vector<16x8xf32>
    %86 = arith.mulf %83, %85 : vector<16x8xf32>
    %87 = vector.extract_strided_slice %31 {offsets = [16, 0], sizes = [8, 32], strides = [1, 1]} : vector<32x32xf32> to vector<8x32xf32>
    %cst_39 = arith.constant dense<0.000000e+00> : vector<16x32xf32>
    %88 = tpu.matmul %86, %87, %cst_39 {dimension_numbers = #tpu.dot_dimension_numbers<[1], [0], [0], [1], [0, 0, 1, 1], [], []>} : vector<16x8xf32>, vector<8x32xf32>, vector<16x32xf32> -> vector<16x32xf32>
    %89 = arith.addf %70, %88 : vector<16x32xf32>
    %90 = vector.extract_strided_slice %27 {offsets = [0, 24], sizes = [16, 8], strides = [1, 1]} : vector<16x32xf32> to vector<16x8xf32>
    %91 = vector.extract_strided_slice %30 {offsets = [0, 24], sizes = [16, 8], strides = [1, 1]} : vector<16x32xf32> to vector<16x8xf32>
    %cst_40 = arith.constant dense<0.000000e+00> : vector<16x16xf32>
    %92 = tpu.matmul %90, %91, %cst_40 {dimension_numbers = #tpu.dot_dimension_numbers<[1], [1], [0], [0], [0, 0, 1, 0], [], []>} : vector<16x8xf32>, vector<16x8xf32>, vector<16x16xf32> -> vector<16x16xf32>
    %93 = arith.addf %92, %14 : vector<16x16xf32>
    %cst_41 = arith.constant dense<0xFF800000> : vector<16xf32>
    %94 = vector.multi_reduction <maximumf>, %93, %cst_41 [1] : vector<16x16xf32> to vector<16xf32>
    %95 = vector.shape_cast %94 : vector<16xf32> to vector<16x1xf32>
    %96 = vector.broadcast %95 : vector<16x1xf32> to vector<16x16xf32>
    %97 = arith.subf %93, %96 : vector<16x16xf32>
    %98 = math.exp %97 : vector<16x16xf32>
    %cst_42 = arith.constant dense<0.000000e+00> : vector<16xf32>
    %99 = vector.multi_reduction <add>, %98, %cst_42 [1] : vector<16x16xf32> to vector<16xf32>
    %100 = vector.shape_cast %99 : vector<16xf32> to vector<16x1xf32>
    %101 = vector.extract_strided_slice %24 {offsets = [0, 24], sizes = [16, 8], strides = [1, 1]} : vector<16x32xf32> to vector<16x8xf32>
    %cst_43 = arith.constant dense<0.000000e+00> : vector<16x8xf32>
    %102 = tpu.matmul %98, %101, %cst_43 {dimension_numbers = #tpu.dot_dimension_numbers<[1], [0], [0], [1], [0, 0, 1, 1], [], []>} : vector<16x16xf32>, vector<16x8xf32>, vector<16x8xf32> -> vector<16x8xf32>
    %103 = tpu.reciprocal %100 : vector<16x1xf32> -> vector<16x1xf32>
    %104 = vector.broadcast %103 : vector<16x1xf32> to vector<16x8xf32>
    %105 = arith.mulf %102, %104 : vector<16x8xf32>
    %106 = vector.extract_strided_slice %31 {offsets = [24, 0], sizes = [8, 32], strides = [1, 1]} : vector<32x32xf32> to vector<8x32xf32>
    %cst_44 = arith.constant dense<0.000000e+00> : vector<16x32xf32>
    %107 = tpu.matmul %105, %106, %cst_44 {dimension_numbers = #tpu.dot_dimension_numbers<[1], [0], [0], [1], [0, 0, 1, 1], [], []>} : vector<16x8xf32>, vector<8x32xf32>, vector<16x32xf32> -> vector<16x32xf32>
    %108 = arith.addf %89, %107 : vector<16x32xf32>
    %c0_45 = arith.constant 0 : index
    %c0_46 = arith.constant 0 : index
    %109 = vector.load %arg7[%c0_45, %c0_46] : memref<1x32xf32, #tpu.memory_space<vmem>>, vector<1x32xf32>
    %110 = vector.broadcast %109 : vector<1x32xf32> to vector<16x32xf32>
    %111 = arith.addf %108, %110 : vector<16x32xf32>
    %c0_47 = arith.constant 0 : index
    %c0_48 = arith.constant 0 : index
    %112 = vector.load %arg10[%c0_47, %c0_48] : memref<16x32xf32, #tpu.memory_space<vmem>>, vector<16x32xf32>
    tpu.vector_store %arg10[%c0_47, %c0_48], %111 {strides = array<i32>} : memref<16x32xf32, #tpu.memory_space<vmem>>, vector<16x32xf32>,
    return
  }
}

</mosaic_0001>

<bundles_post_ra>
// kernel: rope_attention_forward.1
= control target key start
LH: loop header
LB: loop body
LE: loop exit
PB: predicated region body
PF: predicated region fallthrough
CT: control target
= control target key end

     0   :  { %15 = vsyncpa [#allocation3], 0  ;;  %s2742_s0 = inlined_call_operand.hbm [shape: f32[16,32], index: 0, kind: input, shape index: {}]   ;;  %s2743_s1 = inlined_call_operand.hbm [shape: f32[32,32], index: 1, kind: input, shape index: {}]   ;;  %s2744_s2 = inlined_call_operand.vmem [shape: f32[32,32], index: 2, kind: input, shape index: {}]   ;;  %s2745_s3 = inlined_call_operand.hbm [shape: f32[32,32], index: 3, kind: input, shape index: {}]   ;;  %s2746_s4 = inlined_call_operand.hbm [shape: f32[32,32], index: 4, kind: input, shape index: {}]   ;;  %s2747_s5 = inlined_call_operand.hbm [shape: f32[32,32], index: 5, kind: input, shape index: {}]   ;;  %s2748_s6 = inlined_call_operand.hbm [shape: f32[32,32], index: 6, kind: input, shape index: {}]   ;;  %s2749_s7 = inlined_call_operand.vmem [shape: f32[1,32], index: 7, kind: input, shape index: {}]   ;;  %s2750_s8 = inlined_call_operand.hbm [shape: f32[16,32], index: 8, kind: input, shape index: {}]   ;;  %s2751_s9 = inlined_call_operand.hbm [shape: f32[16,32], index: 9, kind: input, shape index: {}]   ;;  %s2752_s10 = inlined_call_operand.hbm [shape: f32[16,32], index: 10, kind: output, shape index: {}]  }
   0x1   :  { %16 = vsyncpa [#allocation6], 0 }
   0x2   :  { %17 = vsyncpa [#allocation9], 0 }
   0x3   :  { %18 = vsyncpa [#allocation12], 0 }
   0x4   :  { %19 = vsyncpa [#allocation15], 0 }
   0x5   :  { %20 = vsyncpa [#allocation4], 0  ;;  %s2360_s13 = smov [#allocation5]   ;;  %s2361_s15 = smov [#allocation8]  }
   0x6   :  { %s38_s14 = sshll.u32 %s2360_s13, 4  ;;  %s64_s16 = sshll.u32 %s2361_s15, 4  ;;  %s39_s14 = int_to_ptr.vmem [resolvable:$true] %s38_s14  ;;  %s2430_s16 = int_to_ptr.vmem [resolvable:$true] %s64_s16 }
   0x7   :  { %s2150_s19 = scalar_lea.hbm %s2743_s1, 512 }
   0x8   :  { %p2151_p0 = scmp.ne.s32.totalorder %s2743_s1, %s2150_s19  ;;  %p2154_p1 = scmp.lt.u32.totalorder %s2150_s19, %s2743_s1 }
   0xa   :  { %p2156_p2 = pnand %p2154_p1, %p2151_p0 }
   0xc   :  { %2159 = shalt.err (!%p2156_p2)
}
   0xd   :  { %s2160_s24 = scalar_lea.vmem %s39_s14, 512  ;;  %p2165_p4 = scmp.lt.s32.totalorder %s39_s14, %s39_s14 }
   0xe   :  { %p2161_p3 = scmp.ne.s32.totalorder %s39_s14, %s2160_s24  ;;  %p2166_p5 = scmp.lt.s32.totalorder %s2160_s24, %s2160_s24 }
  0x10   :  { %p2167_p6 = por %p2166_p5, %p2165_p4 }
  0x12   :  { %p2168_p7 = pnand %p2167_p6, %p2161_p3 }
  0x14   :  { %2171 = shalt.err (!%p2168_p7)
}
  0x15   :  { %s2362_s25 = smov 128   ;;  %s2363_s26 = smov 8  }
  0x16   :  { %44 = dma.hbm_to_vmem [thread:$0]  %s2743_s1, 512, %s39_s14, [#allocation6], %s2362_s25, %s2362_s25, %s2363_s26  }
  0x17   :  { %s2172_s11 = scalar_lea.hbm %s2746_s4, 512 }
  0x18   :  { %p2173_p8 = scmp.ne.s32.totalorder %s2746_s4, %s2172_s11  ;;  %p2176_p9 = scmp.lt.u32.totalorder %s2172_s11, %s2746_s4 }
  0x1a   :  { %p2178_p10 = pnand %p2176_p9, %p2173_p8 }
  0x1c   :  { %2181 = shalt.err (!%p2178_p10)
}
  0x1d   :  { %s2182_s18 = scalar_lea.vmem %s2430_s16, 512  ;;  %p2187_p12 = scmp.lt.s32.totalorder %s2430_s16, %s2430_s16 }
  0x1e   :  { %p2183_p11 = scmp.ne.s32.totalorder %s2430_s16, %s2182_s18  ;;  %p2188_p13 = scmp.lt.s32.totalorder %s2182_s18, %s2182_s18 }
  0x20   :  { %p2189_p0 = por %p2188_p13, %p2187_p12 }
  0x22   :  { %p2190_p1 = pnand %p2189_p0, %p2183_p11 }
  0x24   :  { %2193 = shalt.err (!%p2190_p1)
}
  0x25   :  { %70 = dma.hbm_to_vmem [thread:$0]  %s2746_s4, 512, %s2430_s16, [#allocation9], %s2362_s25, %s2362_s25, %s2363_s26  }
  0x26   :  { %s2364_s19 = smov [#allocation11]   ;;  %s2365_s21 = smov [#allocation2]  }
  0x27   :  { %s88_s20 = sshll.u32 %s2364_s19, 4  ;;  %s26_s22 = sshll.u32 %s2365_s21, 4  ;;  %s89_s20 = int_to_ptr.vmem [resolvable:$true] %s88_s20  ;;  %s2467_s22 = int_to_ptr.vmem [resolvable:$true] %s26_s22 }
  0x28   :  { %s2194_s27 = scalar_lea.hbm %s2748_s6, 512 }
  0x29   :  { %p2195_p2 = scmp.ne.s32.totalorder %s2748_s6, %s2194_s27  ;;  %p2198_p3 = scmp.lt.u32.totalorder %s2194_s27, %s2748_s6 }
  0x2b   :  { %p2200_p4 = pnand %p2198_p3, %p2195_p2 }
  0x2d   :  { %2203 = shalt.err (!%p2200_p4)
}
  0x2e   :  { %s2204_s4 = scalar_lea.vmem %s89_s20, 512  ;;  %p2209_p6 = scmp.lt.s32.totalorder %s89_s20, %s89_s20 }
  0x2f   :  { %p2205_p5 = scmp.ne.s32.totalorder %s89_s20, %s2204_s4  ;;  %p2210_p7 = scmp.lt.s32.totalorder %s2204_s4, %s2204_s4 }
  0x31   :  { %p2211_p8 = por %p2210_p7, %p2209_p6 }
  0x33   :  { %p2212_p9 = pnand %p2211_p8, %p2205_p5 }
  0x35   :  { %2215 = shalt.err (!%p2212_p9)
}
  0x36   :  { %94 = dma.hbm_to_vmem [thread:$0]  %s2748_s6, 512, %s89_s20, [#allocation12], %s2362_s25, %s2362_s25, %s2363_s26  }
  0x37   :  { %s2216_s17 = scalar_lea.hbm %s2742_s0, 256 }
  0x38   :  { %p2217_p10 = scmp.ne.s32.totalorder %s2742_s0, %s2216_s17  ;;  %p2220_p11 = scmp.lt.u32.totalorder %s2216_s17, %s2742_s0 }
  0x3a   :  { %p2222_p12 = pnand %p2220_p11, %p2217_p10 }
  0x3c   :  { %2225 = shalt.err (!%p2222_p12)
}
  0x3d   :  { %s2226_s21 = scalar_lea.vmem %s2467_s22, 256  ;;  %p2231_p0 = scmp.lt.s32.totalorder %s2467_s22, %s2467_s22 }
  0x3e   :  { %p2227_p13 = scmp.ne.s32.totalorder %s2467_s22, %s2226_s21  ;;  %p2232_p1 = scmp.lt.s32.totalorder %s2226_s21, %s2226_s21 }
  0x40   :  { %p2233_p2 = por %p2232_p1, %p2231_p0 }
  0x42   :  { %p2234_p3 = pnand %p2233_p2, %p2227_p13 }
  0x44   :  { %2237 = shalt.err (!%p2234_p3)
}
  0x45   :  { %32 = dma.hbm_to_vmem [thread:$0]  %s2742_s0, 256, %s2467_s22, [#allocation3], %s2362_s25, %s2362_s25, %s2363_s26  }
  0x46   :  { %s2366_s23 = smov [#allocation7]   ;;  %s2367_s27 = smov [#allocation10]  }
  0x47   :  { %s52_s24 = sshll.u32 %s2366_s23, 4  ;;  %s76_s28 = sshll.u32 %s2367_s27, 4  ;;  %s53_s24 = int_to_ptr.vmem [resolvable:$true] %s52_s24  ;;  %s2504_s28 = int_to_ptr.vmem [resolvable:$true] %s76_s28 }
  0x48   :  { %s2238_s11 = scalar_lea.hbm %s2745_s3, 512 }
  0x49   :  { %p2239_p4 = scmp.ne.s32.totalorder %s2745_s3, %s2238_s11  ;;  %p2242_p5 = scmp.lt.u32.totalorder %s2238_s11, %s2745_s3 }
  0x4b   :  { %p2244_p6 = pnand %p2242_p5, %p2239_p4 }
  0x4d   :  { %2247 = shalt.err (!%p2244_p6)
}
  0x4e   :  { %s2248_s0 = scalar_lea.vmem %s53_s24, 512  ;;  %p2253_p8 = scmp.lt.s32.totalorder %s53_s24, %s53_s24 }
  0x4f   :  { %p2249_p7 = scmp.ne.s32.totalorder %s53_s24, %s2248_s0  ;;  %p2254_p9 = scmp.lt.s32.totalorder %s2248_s0, %s2248_s0 }
  0x51   :  { %p2255_p10 = por %p2254_p9, %p2253_p8 }
  0x53   :  { %p2256_p11 = pnand %p2255_p10, %p2249_p7 }
  0x55   :  { %2259 = shalt.err (!%p2256_p11)
}
  0x56   :  { %58 = dma.hbm_to_vmem [thread:$0]  %s2745_s3, 512, %s53_s24, [#allocation6], %s2362_s25, %s2362_s25, %s2363_s26  }
  0x57   :  { %s2260_s1 = scalar_lea.hbm %s2747_s5, 512 }
  0x58   :  { %p2261_p12 = scmp.ne.s32.totalorder %s2747_s5, %s2260_s1  ;;  %p2264_p13 = scmp.lt.u32.totalorder %s2260_s1, %s2747_s5 }
  0x5a   :  { %p2266_p0 = pnand %p2264_p13, %p2261_p12 }
  0x5c   :  { %2269 = shalt.err (!%p2266_p0)
}
  0x5d   :  { %s2270_s20 = scalar_lea.vmem %s2504_s28, 512  ;;  %p2275_p2 = scmp.lt.s32.totalorder %s2504_s28, %s2504_s28 }
  0x5e   :  { %p2271_p1 = scmp.ne.s32.totalorder %s2504_s28, %s2270_s20  ;;  %p2276_p3 = scmp.lt.s32.totalorder %s2270_s20, %s2270_s20 }
  0x60   :  { %p2277_p4 = por %p2276_p3, %p2275_p2 }
  0x62   :  { %p2278_p5 = pnand %p2277_p4, %p2271_p1 }
  0x64   :  { %2281 = shalt.err (!%p2278_p5)
}
  0x65   :  { %82 = dma.hbm_to_vmem [thread:$0]  %s2747_s5, 512, %s2504_s28, [#allocation9], %s2362_s25, %s2362_s25, %s2363_s26  }
  0x66   :  { %s2368_s24 = smov [#allocation13]   ;;  %s2369_s29 = smov [#allocation14]  }
  0x67   :  { %s102_s27 = sshll.u32 %s2368_s24, 4  ;;  %s114_s30 = sshll.u32 %s2369_s29, 4  ;;  %s103_s27 = int_to_ptr.vmem [resolvable:$true] %s102_s27  ;;  %s2541_s30 = int_to_ptr.vmem [resolvable:$true] %s114_s30 }
  0x68   :  { %s2282_s16 = scalar_lea.hbm %s2750_s8, 256 }
  0x69   :  { %p2283_p6 = scmp.ne.s32.totalorder %s2750_s8, %s2282_s16  ;;  %p2286_p7 = scmp.lt.u32.totalorder %s2282_s16, %s2750_s8 }
  0x6b   :  { %p2288_p8 = pnand %p2286_p7, %p2283_p6 }
  0x6d   :  { %2291 = shalt.err (!%p2288_p8)
}
  0x6e   :  { %s2292_s5 = scalar_lea.vmem %s103_s27, 256  ;;  %p2297_p10 = scmp.lt.s32.totalorder %s103_s27, %s103_s27 }
  0x6f   :  { %p2293_p9 = scmp.ne.s32.totalorder %s103_s27, %s2292_s5  ;;  %p2298_p11 = scmp.lt.s32.totalorder %s2292_s5, %s2292_s5 }
  0x71   :  { %p2299_p12 = por %p2298_p11, %p2297_p10 }
  0x73   :  { %p2300_p13 = pnand %p2299_p12, %p2293_p9 }
  0x75   :  { %2303 = shalt.err (!%p2300_p13)
}
  0x76   :  { %108 = dma.hbm_to_vmem [thread:$0]  %s2750_s8, 256, %s103_s27, [#allocation12], %s2362_s25, %s2362_s25, %s2363_s26  }
  0x77   :  { %s2304_s1 = scalar_lea.hbm %s2751_s9, 256 }
  0x78   :  { %p2305_p0 = scmp.ne.s32.totalorder %s2751_s9, %s2304_s1  ;;  %p2308_p1 = scmp.lt.u32.totalorder %s2304_s1, %s2751_s9 }
  0x7a   :  { %p2310_p2 = pnand %p2308_p1, %p2305_p0 }
  0x7c   :  { %2313 = shalt.err (!%p2310_p2)
}
  0x7d   :  { %s2314_s20 = scalar_lea.vmem %s2541_s30, 256  ;;  %p2319_p4 = scmp.lt.s32.totalorder %s2541_s30, %s2541_s30 }
  0x7e   :  { %p2315_p3 = scmp.ne.s32.totalorder %s2541_s30, %s2314_s20  ;;  %p2320_p5 = scmp.lt.s32.totalorder %s2314_s20, %s2314_s20 }
  0x80   :  { %p2321_p6 = por %p2320_p5, %p2319_p4 }
  0x82   :  { %p2322_p7 = pnand %p2321_p6, %p2315_p3 }
  0x84   :  { %2325 = shalt.err (!%p2322_p7)
}
  0x85   :  { %120 = dma.hbm_to_vmem [thread:$0]  %s2751_s9, 256, %s2541_s30, [#allocation15], %s2362_s25, %s2362_s25, %s2363_s26  }
  0x86   :  { %2348 = dma.done.wait [#allocation3], 256  }
  0x87   :  { %2349 = vsyncadd [#allocation3], 4294967040 }
  0x88   :  { %2350 = dma.done.wait [#allocation6], 1024  }
  0x89   :  { %2351 = vsyncadd [#allocation6], 4294966272 }
  0x8a   :  { %2352 = dma.done.wait [#allocation9], 1024  }
  0x8b   :  { %2353 = vsyncadd [#allocation9], 4294966272 }
  0x8c   :  { %2354 = dma.done.wait [#allocation12], 768  }
  0x8d   :  { %2355 = vsyncadd [#allocation12], 4294966528 }
  0x8e   :  { %2356 = dma.done.wait [#allocation15], 256  }
  0x8f   :  { %2357 = vsyncadd [#allocation15], 4294967040  ;;  %v167_v0 = vld [vmem:[#allocation5] sm:$0xff]  ;;  %v168_v1 = vld [vmem:[#allocation5 + $0x8] sm:$0xff]  ;;  %vm171_vm0 = vcmask 261120   ;;  %vm585_vm1 = vcmask 64512  }
  0x90   :  { %v253_v2 = vld [vmem:[%s2744_s2] sm:$0xff]  ;;  %v1987_v3 = vpack.c.bf16 %v168_v1, %v167_v0  ;;  %v254_v4 = vld [vmem:[%s2744_s2 + $0x8] sm:$0xff]  ;;  %v255_v9 = vld [vmem:[%s2744_s2 + $0x10] sm:$0xff]  ;;  %s2371_s16 = smov 112   ;;  %vm673_vm9 = vcmask 130048   ;;  %s2373_s12 = smov 104  }
  0x91   :  { %v169_v5 = vld [vmem:[#allocation5 + $0x10] sm:$0xff]  ;;  %v170_v6 = vld [vmem:[#allocation5 + $0x18] sm:$0xff]  ;;  %v1995_v7 = vpack.c.bf16 %v254_v4, %v253_v2  ;;  %v256_v10 = vld [vmem:[%s2744_s2 + $0x18] sm:$0xff]  ;;  %s2370_s2 = smov 120   ;;  %v151_v2 = vlaneseq  ;;  %s2374_s22 = smov [#allocation16]  }
  0x92   :  { %v1991_v8 = vpack.c.bf16 %v170_v6, %v169_v5  ;;  %v145_v11 = vld [vmem:[#allocation2] sm:$0xff]  ;;  %1988 = vmatprep.subr.bf16.mxu0 %v1987_v3  ;;  %v1999_v12 = vpack.c.bf16 %v256_v10, %v255_v9  ;;  %v332_v13 = vld [vmem:[#allocation7] sm:$0xff]  ;;  %v333_v14 = vld [vmem:[#allocation7 + $0x8] sm:$0xff]  ;;  %v2372_v9 = vmov -1e+30   ;;  %s1723_s5 = sshll.u32 %s2374_s22, 4  ;;  %s1724_s5 = int_to_ptr.vmem [resolvable:$true] %s1723_s5 }
  0x93   :  { %1864 = vmatprep.mubr.msk.f32.mxu0 %vm171_vm0, %v145_v11  ;;  %1996 = vmatprep.subr.bf16.mxu1 %v1995_v7  ;;  %v411_v15 = vld [vmem:[#allocation8] sm:$0xff]  ;;  %v412_v16 = vld [vmem:[#allocation8 + $0x8] sm:$0xff]  ;;  %v2003_v17 = vpack.c.bf16 %v333_v14, %v332_v13  ;;  %v334_v19 = vld [vmem:[#allocation7 + $0x10] sm:$0xff]  ;;  %v155_v4 = vand.u32 127, %v151_v2  ;;  %s2326_s28 = scalar_lea.vmem %s1724_s5, 256  ;;  %p2331_p9 = scmp.lt.s32.totalorder %s1724_s5, %s1724_s5 }
  0x94   :  { %1990 = vmatpush3.bf16.msra.mxu0 %v1987_v3  ;;  %1998 = vmatpush3.bf16.msra.mxu1 %v1995_v7  ;;  %v2011_v18 = vpack.c.bf16 %v412_v16, %v411_v15  ;;  %v335_v20 = vld [vmem:[#allocation7 + $0x18] sm:$0xff]  ;;  %v413_v21 = vld [vmem:[#allocation8 + $0x10] sm:$0xff]  ;;  %v490_v26 = vld [vmem:[#allocation10] sm:$0xff]  ;;  %v152_v3 = vshrl.u32 %v151_v2, 7  ;;  %p2327_p8 = scmp.ne.s32.totalorder %s1724_s5, %s2326_s28  ;;  %p2332_p10 = scmp.lt.s32.totalorder %s2326_s28, %s2326_s28 }
  0x95   :  { %1992 = vmatprep.subr.bf16.mxu0 %v1991_v8  ;;  %2000 = vmatprep.subr.bf16.mxu1 %v1999_v12  ;;  %v414_v22 = vld [vmem:[#allocation8 + $0x18] sm:$0xff]  ;;  %v2007_v24 = vpack.c.bf16 %v335_v20, %v334_v19  ;;  %v491_v27 = vld [vmem:[#allocation10 + $0x8] sm:$0xff]  ;;  %v492_v29 = vld [vmem:[#allocation10 + $0x10] sm:$0xff]  ;;  %v158_v6 = vshra.s32 %v155_v4, 3 }
  0x96   :  { %1875 = vmatprep.mubr.msk.f32.mxu1 %vm171_vm0, %v145_v11  ;;  %v146_v23 = vld [vmem:[#allocation2 + $0x8] sm:$0xff]  ;;  %v2015_v25 = vpack.c.bf16 %v414_v22, %v413_v21  ;;  %v2019_v28 = vpack.c.bf16 %v491_v27, %v490_v26  ;;  %v148_v32 = vld [vmem:[#allocation13 + $0x8] sm:$0xff]  ;;  %v147_v34 = vld [vmem:[#allocation13] sm:$0xff]  ;;  %v153_v5 = vadd.s32 8, %v152_v3  ;;  %v156_v7 = vshra.s32 %v152_v3, 3  ;;  %p2333_p11 = por %p2332_p10, %p2331_p9 }
  0x97   :  { %v493_v30 = vld [vmem:[#allocation10 + $0x18] sm:$0xff]  ;;  %v149_v36 = vld [vmem:[#allocation14] sm:$0xff]  ;;  %vm2608_vm2 = vmpackc.low %vm585_vm1, %vm585_vm1  ;;  %vm161_vm4 = vcmp.ge.s32.totalorder %v152_v3, %v155_v4 }
  0x98   :  { %1994 = vmatpush3.bf16.msra.mxu0 %v1991_v8  ;;  %2002 = vmatpush3.bf16.msra.mxu1 %v1999_v12  ;;  %v2023_v31 = vpack.c.bf16 %v493_v30, %v492_v29  ;;  %v150_v33 = vld [vmem:[#allocation14 + $0x8] sm:$0xff]  ;;  %v157_v8 = vshra.s32 %v153_v5, 3  ;;  %vm159_vm3 = vcmp.eq.s32.totalorder %v156_v7, %v158_v6  ;;  %vm162_vm6 = vcmp.ge.s32.totalorder %v153_v5, %v155_v4  ;;  %v582_v7 = vld [vmem:[#allocation11 + $0x8] sm:$0xff]  ;;  %p2334_p12 = pnand %p2333_p11, %p2327_p8 }
  0x99   :  { %2004 = vmatprep.subr.bf16.mxu0 %v2003_v17  ;;  %2012 = vmatprep.subr.bf16.mxu1 %v2011_v18  ;;  %vm163_vm7 = vmand %vm159_vm3, %vm161_vm4 }
  0x9a   :  { %vm160_vm5 = vcmp.eq.s32.totalorder %v157_v8, %v158_v6  ;;  %v2632_v10 = vsel %vm163_vm7, 0.0, %v2372_v9  ;;  %v581_v8 = vld [vmem:[#allocation11] sm:$0xff] }
  0x9b   :  { %1865 = vmatmul.mubr.msk.f32.vlgmr.msra.gmra.mrb[0].mxu0 %vm171_vm0, %v146_v23  ;;  %1876 = vmatmul.mubr.msk.f32.vlgmr.msra.gmra.mrb[0].mxu1 %vm171_vm0, %v146_v23  ;;  %vm164_vm8 = vmand %vm160_vm5, %vm162_vm6 }
  0x9c   :  { %2006 = vmatpush3.bf16.msra.mxu0 %v2003_v17  ;;  %2014 = vmatpush3.bf16.msra.mxu1 %v2011_v18  ;;  %v2634_v12 = vsel %vm164_vm8, 0.0, %v2372_v9 }
  0x9d   :  { %2008 = vmatprep.subr.bf16.mxu0 %v2007_v24  ;;  %2016 = vmatprep.subr.bf16.mxu1 %v2015_v25 }
  0x9e   :  { %1886 = vmatprep.mubr.msk.f32.mxu0 %vm171_vm0, %v145_v11  ;;  %1897 = vmatprep.mubr.msk.f32.mxu1 %vm171_vm0, %v145_v11 }
  0xa0   :  { %2010 = vmatpush3.bf16.msra.mxu0 %v2007_v24  ;;  %2018 = vmatpush3.bf16.msra.mxu1 %v2015_v25 }
  0xa1   :  { %2020 = vmatprep.subr.bf16.mxu0 %v2019_v28 }
  0xa3   :  { %1887 = vmatmul.mubr.msk.f32.vlgmr.msra.gmra.mrb[2].mxu0 %vm171_vm0, %v146_v23  ;;  %1898 = vmatmul.mubr.msk.f32.vlgmr.msra.gmra.mrb[2].mxu1 %vm171_vm0, %v146_v23 }
  0xa4   :  { %2022 = vmatpush3.bf16.msra.mxu0 %v2019_v28  ;;  %1908 = vmatprep.mubr.msk.f32.mxu0 %vm171_vm0, %v145_v11 }
  0xa5   :  { %2024 = vmatprep.subr.bf16.mxu0 %v2023_v31 }
  0xa8   :  { %2026 = vmatpush3.bf16.msra.mxu0 %v2023_v31 }
  0xab   :  { %1909 = vmatmul.mubr.msk.f32.vlgmr.msra.gmra.mrb[4].mxu0 %vm171_vm0, %v146_v23 }
 0x16e   :  { %v1866_v35 = vpop.f32.mrb[0].mxu0  ;;  %v1877_v38 = vpop.f32.mrb[0].mxu1 }
 0x16f   :  { %v570_v37 = vmul.f32 %v1866_v35, %v148_v32  ;;  %v244_v39 = vpop.f32.mrb[1].mxu0  ;;  %v572_v40 = vmul.f32 %v1877_v38, %v150_v33  ;;  %v323_v42 = vpop.f32.mrb[1].mxu1 }
 0x170   :  { %v569_v41 = vmul.f32 %v244_v39, %v147_v34  ;;  %v571_v43 = vmul.f32 %v323_v42, %v149_v36 }
 0x171   :  { %v2600_v44 = vadd.f32 %v572_v40, %v570_v37 }
 0x172   :  { %v2602_v45 = vadd.f32 %v571_v43, %v569_v41 }
 0x174   :  { %1915 = vmatprep.mubr.msk.f32.mxu1 %vm585_vm1, %v2602_v45 }
 0x176   :  { %v1888_v46 = vpop.f32.mrb[2].mxu0  ;;  %v1899_v48 = vpop.f32.mrb[2].mxu1 }
 0x177   :  { %v576_v47 = vmul.f32 %v1888_v46, %v148_v32  ;;  %v402_v49 = vpop.f32.mrb[3].mxu0  ;;  %v578_v50 = vmul.f32 %v1899_v48, %v150_v33  ;;  %v481_v52 = vpop.f32.mrb[3].mxu1 }
 0x178   :  { %v575_v51 = vmul.f32 %v402_v49, %v147_v34  ;;  %v577_v53 = vmul.f32 %v481_v52, %v149_v36 }
 0x179   :  { %v580_v54 = vadd.f32 %v578_v50, %v576_v47 }
 0x17a   :  { %v579_v55 = vadd.f32 %v577_v53, %v575_v51 }
 0x17c   :  { %v2612_v57 = vpack.i.bf16 %v580_v54, %v579_v55  ;;  %v2027_v58 = vpack.c.bf16 %v580_v54, %v579_v55 }
 0x17e   :  { %v1910_v59 = vpop.f32.mrb[4].mxu0  ;;  %2089 = vrot.lane.b32.xlu1 %v2612_v57, %s2370_s2  ;;  %2029 = vmatprep.subr.msk.bf16.mxu1 %vm2608_vm2, %v2027_v58 }
 0x17f   :  { %v560_v60 = vpop.f32.mrb[5].mxu0  ;;  %2032 = vmatpush3.bf16.xpose.msk.msra.mxu1 %vm2608_vm2, %v2027_v58 }
 0x180   :  { %v2033_v61 = vpack.c.bf16 %v1910_v59, %v560_v60  ;;  %v2640_v18 = vpack.i.bf16 %v1910_v59, %v560_v60 }
 0x182   :  { %2034 = vmatprep.subr.bf16.mxu1 %v2033_v61  ;;  %777 = vrot.lane.b32.xlu1 %v2602_v45, %s2370_s2 }
 0x186   :  { %2094 = vrot.lane.b32.xlu1 %v2612_v57, %s2371_s16  ;;  %1916 = vmatmul.mubr.msk.f32.vlgmr.msra.gmra.mrb[4].mxu1 %vm585_vm1, %v2600_v44 }
 0x187   :  { %2036 = vmatpush3.bf16.msra.mxu1 %v2033_v61 }
 0x18a   :  { %1141 = vrot.lane.b32.xlu1 %v2602_v45, %s2371_s16 }
 0x18e   :  { %1143 = vrot.lane.b32.xlu1 %v2600_v44, %s2371_s16 }
 0x1f0   :  { %v2090_v62 = vpop.permute.xlu1 %2089 }
 0x1f1   :  { %v2092_v63 = vunpack.i.h.bf16 %v2090_v62  ;;  %v2091_v0 = vunpack.i.l.bf16 %v2090_v62 }
 0x1f3   :  { %v2037_v1 = vpack.c.bf16 %v2092_v63, %v2091_v0 }
 0x1f4   :  { %v778_v24 = vpop.permute.xlu1 %777 }
 0x1f5   :  { %2039 = vmatprep.subr.msk.bf16.mxu1 %vm2608_vm2, %v2037_v1 }
 0x1f8   :  { %v2095_v26 = vpop.permute.xlu1 %2094 }
 0x1f9   :  { %v2097_v28 = vunpack.i.h.bf16 %v2095_v26  ;;  %v2096_v29 = vunpack.i.l.bf16 %v2095_v26 }
 0x1fb   :  { %v2047_v31 = vpack.c.bf16 %v2097_v28, %v2096_v29 }
 0x1fc   :  { %v1142_v33 = vpop.permute.xlu1 %1141 }
 0x200   :  { %v1144_v34 = vpop.permute.xlu1 %1143 }
 0x259   :  { %v1917_v11 = vpop.f32.mrb[4].mxu1 }
 0x25a   :  { %v664_v13 = vpop.f32.mrb[5].mxu1  ;;  %v670_v15 = vadd.f32 %v1917_v11, %v2634_v12 }
 0x25b   :  { %v665_v14 = vadd.f32 %v664_v13, %v2632_v10 }
 0x25c   :  { %v677_v17 = vsel %vm673_vm9, %v670_v15, -inf }
 0x25d   :  { %v674_v16 = vsel %vm673_vm9, %v665_v14, -inf }
 0x25e   :  { %675 = vmax.xlane.f32.xlu0 %v674_v16 }
 0x262   :  { %678 = vmax.xlane.f32.xlu0 %v677_v17 }
 0x278   :  { %779 = vrot.lane.b32.xlu0 %v2600_v44, %s2370_s2 }
 0x2eb   :  { %v676_v19 = vpop.xlane.xlu0 %675 }
 0x2ec   :  { %v680_v20 = vsub.f32 %v665_v14, %v676_v19 }
 0x2ee   :  { %v682_v21 = vmul.f32 1.442695, %v680_v20 }
 0x2ef   :  { %v679_v22 = vpop.xlane.xlu0 %678 }
 0x2f0   :  { %2118 = vpow2.f32 %v682_v21  ;;  %v681_v23 = vsub.f32 %v670_v15, %v679_v22 }
 0x2f2   :  { %v684_v25 = vmul.f32 1.442695, %v681_v23 }
 0x2f3   :  { %v780_v32 = vpop.permute.xlu0 %779 }
 0x2f4   :  { %2120 = vpow2.f32 %v684_v25 }
 0x2fa   :  { %v2644_v27 = vpop.eup %2118 }
 0x2fb   :  { %1922 = vmatprep.mubr.msk.f32.mxu1 %vm673_vm9, %v2644_v27  ;;  %v686_v2 = vsel %vm673_vm9, %v2644_v27, 0.0 }
 0x2fe   :  { %v2648_v30 = vpop.eup %2120 }
 0x2ff   :  { %1923 = vmatmul.mubr.msk.f32.vlgmr.msra.gmra.mrb[6].mxu1 %vm673_vm9, %v2648_v30  ;;  %v689_v4 = vsel %vm673_vm9, %v2648_v30, 0.0 }
 0x300   :  { %2042 = vmatpush3.bf16.xpose.msk.msra.mxu1 %vm2608_vm2, %v2037_v1  ;;  %1929 = vmatprep.mubr.msk.f32.mxu1 %vm585_vm1, %v778_v24 }
 0x301   :  { %2049 = vmatprep.subr.msk.bf16.mxu1 %vm2608_vm2, %v2047_v31 }
 0x307   :  { %1930 = vmatmul.mubr.msk.f32.vlgmr.msra.gmra.mrb[8].mxu1 %vm585_vm1, %v780_v32 }
 0x308   :  { %2052 = vmatpush3.bf16.xpose.msk.msra.mxu1 %vm2608_vm2, %v2047_v31  ;;  %1953 = vmatprep.mubr.msk.f32.mxu1 %vm585_vm1, %v1142_v33 }
 0x30f   :  { %1954 = vmatmul.mubr.msk.f32.vlgmr.msra.gmra.mrb[10].mxu1 %vm585_vm1, %v1144_v34 }
 0x3d2   :  { %v2662_v35 = vpop.f32.mrb[6].mxu1 }
 0x3d3   :  { %v2664_v36 = vpop.f32.mrb[7].mxu1 }
 0x3da   :  { %v1931_v37 = vpop.f32.mrb[8].mxu1 }
 0x3db   :  { %v865_v38 = vadd.f32 %v1931_v37, %v2634_v12  ;;  %v859_v39 = vpop.f32.mrb[9].mxu1 }
 0x3dc   :  { %v860_v40 = vadd.f32 %v859_v39, %v2632_v10 }
 0x3dd   :  { %v871_v41 = vsel %vm673_vm9, %v865_v38, -inf }
 0x3de   :  { %872 = vmax.xlane.f32.xlu0 %v871_v41  ;;  %v868_v42 = vsel %vm673_vm9, %v860_v40, -inf }
 0x3df   :  { %869 = vmax.xlane.f32.xlu1 %v868_v42 }
 0x3e2   :  { %v1955_v43 = vpop.f32.mrb[10].mxu1 }
 0x3e3   :  { %v1223_v46 = vpop.f32.mrb[11].mxu1  ;;  %v1229_v3 = vadd.f32 %v1955_v43, %v2634_v12 }
 0x3e4   :  { %v1224_v56 = vadd.f32 %v1223_v46, %v2632_v10 }
 0x3e5   :  { %v1235_v6 = vsel %vm673_vm9, %v1229_v3, -inf }
 0x3e6   :  { %v1232_v5 = vsel %vm673_vm9, %v1224_v56, -inf }
 0x3f0   :  { %2099 = vrot.lane.b32.xlu1 %v2640_v18, %s2370_s2 }
 0x3f4   :  { %2104 = vrot.lane.b32.xlu0 %v2612_v57, %s2373_s12  ;;  %1424 = vrot.lane.b32.xlu1 %v2602_v45, %s2373_s12 }
 0x3f8   :  { %1426 = vrot.lane.b32.xlu1 %v2600_v44, %s2373_s12 }
 0x46b   :  { %v873_v47 = vpop.xlane.xlu0 %872 }
 0x46c   :  { %v875_v48 = vsub.f32 %v865_v38, %v873_v47  ;;  %v870_v49 = vpop.xlane.xlu1 %869  ;;  %v583_v47 = vld [vmem:[#allocation11 + $0x10] sm:$0xff] }
 0x46d   :  { %v874_v50 = vsub.f32 %v860_v40, %v870_v49 }
 0x46e   :  { %v878_v51 = vmul.f32 1.442695, %v875_v48 }
 0x46f   :  { %v876_v52 = vmul.f32 1.442695, %v874_v50  ;;  %v2105_v53 = vpop.permute.xlu0 %2104 }
 0x470   :  { %2122 = vpow2.f32 %v878_v51  ;;  %v2107_v54 = vunpack.i.h.bf16 %v2105_v53  ;;  %v2106_v55 = vunpack.i.l.bf16 %v2105_v53  ;;  %v2100_v58 = vpop.permute.xlu1 %2099 }
 0x471   :  { %2124 = vpow2.f32 %v876_v52  ;;  %v2102_v59 = vunpack.i.h.bf16 %v2100_v58  ;;  %v2101_v57 = vunpack.i.l.bf16 %v2100_v58 }
 0x472   :  { %v2057_v60 = vpack.c.bf16 %v2107_v54, %v2106_v55 }
 0x473   :  { %v2043_v61 = vpack.c.bf16 %v2102_v59, %v2101_v57 }
 0x474   :  { %2059 = vmatprep.subr.msk.bf16.mxu1 %vm2608_vm2, %v2057_v60  ;;  %v1425_v44 = vpop.permute.xlu1 %1424 }
 0x475   :  { %2044 = vmatprep.subr.bf16.mxu0 %v2043_v61  ;;  %2062 = vmatpush3.bf16.xpose.msk.msra.mxu1 %vm2608_vm2, %v2057_v60 }
 0x476   :  { %1972 = vmatprep.mubr.msk.f32.mxu1 %vm585_vm1, %v1425_v44  ;;  %2046 = vmatpush3.bf16.msra.mxu0 %v2043_v61 }
 0x477   :  { %1939 = vmatprep.subr.mxu0 %v582_v7 }
 0x478   :  { %v1427_v0 = vpop.permute.xlu1 %1426 }
 0x47a   :  { %v2123_v45 = vpop.eup %2122 }
 0x47b   :  { %v2125_v62 = vpop.eup %2124  ;;  %v883_v63 = vsel %vm673_vm9, %v2123_v45, 0.0 }
 0x47c   :  { %884 = vadd.xlane.f32.xlu0 %v883_v63  ;;  %1936 = vmatprep.mubr.msk.f32.mxu0 %vm673_vm9, %v2125_v62  ;;  %v880_v1 = vsel %vm673_vm9, %v2125_v62, 0.0 }
 0x47d   :  { %1973 = vmatmul.mubr.msk.f32.vlgmr.msra.gmra.mrb[12].mxu1 %vm585_vm1, %v1427_v0  ;;  %881 = vadd.xlane.f32.xlu1 %v880_v1 }
 0x47e   :  { %1937 = vmatmul.mubr.msk.f32.vlgmr.msra.gmra.mrb[6].mxu0 %vm673_vm9, %v2123_v45 }
 0x47f   :  { %1940 = vmatpush3.msra.mxu0 %v582_v7 }
 0x480   :  { %687 = vadd.xlane.f32.xlu0 %v686_v2  ;;  %1944 = vmatprep.subr.mxu0 %v581_v8  ;;  %v584_v2 = vld [vmem:[#allocation11 + $0x18] sm:$0xff] }
 0x481   :  { %690 = vadd.xlane.f32.xlu1 %v689_v4 }
 0x484   :  { %1233 = vmax.xlane.f32.xlu0 %v1232_v5 }
 0x485   :  { %1236 = vmax.xlane.f32.xlu1 %v1235_v6 }
 0x49a   :  { %2109 = vrot.lane.b32.xlu0 %v2640_v18, %s2371_s16 }
 0x509   :  { %v885_v11 = vpop.xlane.xlu0 %884 }
 0x50a   :  { %v882_v9 = vpop.xlane.xlu1 %881 }
 0x50b   :  { %2126 = vrcp.f32 %v882_v9 }
 0x50d   :  { %v688_v14 = vpop.xlane.xlu0 %687 }
 0x50e   :  { %v691_v13 = vpop.xlane.xlu1 %690  ;;  %2128 = vrcp.f32 %v688_v14 }
 0x50f   :  { %2130 = vrcp.f32 %v885_v11 }
 0x510   :  { %2132 = vrcp.f32 %v691_v13  ;;  %v1781_v13 = vld [vmem:[%s2749_s7] ss:$0 sm:$0xff] }
 0x511   :  { %v1234_v17 = vpop.xlane.xlu0 %1233 }
 0x512   :  { %v1237_v15 = vpop.xlane.xlu1 %1236  ;;  %v1238_v19 = vsub.f32 %v1224_v56, %v1234_v17 }
 0x513   :  { %v1239_v16 = vsub.f32 %v1229_v3, %v1237_v15 }
 0x514   :  { %v1240_v21 = vmul.f32 1.442695, %v1238_v19 }
 0x515   :  { %v1242_v20 = vmul.f32 1.442695, %v1239_v16  ;;  %v2110_v22 = vpop.permute.xlu0 %2109  ;;  %v2127_v24 = vpop.eup %2126 }
 0x516   :  { %v2112_v28 = vunpack.i.h.bf16 %v2110_v22  ;;  %v2111_v29 = vunpack.i.l.bf16 %v2110_v22 }
 0x517   :  { %2134 = vpow2.f32 %v1242_v20 }
 0x518   :  { %v2129_v27 = vpop.eup %2128  ;;  %2136 = vpow2.f32 %v1240_v21  ;;  %v2053_v40 = vpack.c.bf16 %v2112_v28, %v2111_v29 }
 0x519   :  { %v2131_v32 = vpop.eup %2130  ;;  %v775_v39 = vmul.f32 %v2129_v27, %v2664_v36 }
 0x550   :  { %v1974_v23 = vpop.f32.mrb[12].mxu1 }
 0x551   :  { %v1938_v25 = vpop.f32.mrb[6].mxu0  ;;  %v1506_v26 = vpop.f32.mrb[13].mxu1  ;;  %v1512_v34 = vadd.f32 %v1974_v23, %v2634_v12 }
 0x552   :  { %v1507_v30 = vadd.f32 %v1506_v26, %v2632_v10  ;;  %v966_v31 = vpop.f32.mrb[7].mxu0  ;;  %v978_v37 = vmul.f32 %v2131_v32, %v1938_v25  ;;  %v2133_v10 = vpop.eup %2132 }
 0x553   :  { %v977_v33 = vmul.f32 %v2127_v24, %v966_v31  ;;  %v1518_v41 = vsel %vm673_vm9, %v1512_v34, -inf  ;;  %v2135_v42 = vpop.eup %2134  ;;  %v776_v12 = vmul.f32 %v2133_v10, %v2662_v35 }
 0x554   :  { %v1515_v38 = vsel %vm673_vm9, %v1507_v30, -inf  ;;  %v1247_v43 = vsel %vm673_vm9, %v2135_v42, 0.0  ;;  %v2137_v46 = vpop.eup %2136 }
 0x555   :  { %1516 = vmax.xlane.f32.xlu1 %v1515_v38  ;;  %1941 = vmatprep.mubr.msk.f32.mxu0 %vm585_vm1, %v977_v33  ;;  %v1244_v36 = vsel %vm673_vm9, %v2137_v46, 0.0 }
 0x556   :  { %1942 = vmatmul.mubr.msk.f32.vlgmr.msra.gmra.mrb[8].mxu0 %vm585_vm1, %v978_v37 }
 0x557   :  { %1945 = vmatpush3.msra.mxu0 %v581_v8  ;;  %1946 = vmatprep.mubr.msk.f32.mxu0 %vm585_vm1, %v775_v39 }
 0x558   :  { %2054 = vmatprep.subr.bf16.mxu0 %v2053_v40 }
 0x559   :  { %1519 = vmax.xlane.f32.xlu1 %v1518_v41 }
 0x55d   :  { %1248 = vadd.xlane.f32.xlu1 %v1247_v43 }
 0x55e   :  { %1947 = vmatmul.mubr.msk.f32.vlgmr.msra.gmra.mrb[8].mxu0 %vm585_vm1, %v776_v12 }
 0x55f   :  { %2056 = vmatpush3.bf16.msra.mxu0 %v2053_v40  ;;  %1960 = vmatprep.mubr.msk.f32.mxu0 %vm673_vm9, %v2137_v46 }
 0x560   :  { %1963 = vmatprep.subr.mxu0 %v583_v47 }
 0x561   :  { %1245 = vadd.xlane.f32.xlu1 %v1244_v36 }
 0x562   :  { %1961 = vmatmul.mubr.msk.f32.vlgmr.msra.gmra.mrb[10].mxu0 %vm673_vm9, %v2135_v42 }
 0x563   :  { %1964 = vmatpush3.msra.mxu0 %v583_v47 }
 0x572   :  { %2114 = vrot.lane.b32.xlu1 %v2640_v18, %s2373_s12 }
 0x5e2   :  { %v1517_v35 = vpop.xlane.xlu1 %1516 }
 0x5e3   :  { %v1521_v48 = vsub.f32 %v1507_v30, %v1517_v35 }
 0x5e5   :  { %v1523_v49 = vmul.f32 1.442695, %v1521_v48 }
 0x5e6   :  { %v1520_v50 = vpop.xlane.xlu1 %1519 }
 0x5e7   :  { %2138 = vpow2.f32 %v1523_v49  ;;  %v1522_v51 = vsub.f32 %v1512_v34, %v1520_v50 }
 0x5e9   :  { %v1525_v52 = vmul.f32 1.442695, %v1522_v51 }
 0x5ea   :  { %v1249_v53 = vpop.xlane.xlu1 %1248 }
 0x5eb   :  { %2140 = vpow2.f32 %v1525_v52 }
 0x5ec   :  { %2142 = vrcp.f32 %v1249_v53 }
 0x5ee   :  { %v1246_v54 = vpop.xlane.xlu1 %1245 }
 0x5ef   :  { %2144 = vrcp.f32 %v1246_v54 }
 0x5f1   :  { %v2139_v55 = vpop.eup %2138 }
 0x5f2   :  { %v2115_v58 = vpop.permute.xlu1 %2114  ;;  %v1527_v59 = vsel %vm673_vm9, %v2139_v55, 0.0 }
 0x5f3   :  { %v2117_v57 = vunpack.i.h.bf16 %v2115_v58  ;;  %v2116_v60 = vunpack.i.l.bf16 %v2115_v58  ;;  %1528 = vadd.xlane.f32.xlu0 %v1527_v59 }
 0x5f5   :  { %v2141_v18 = vpop.eup %2140  ;;  %v2063_v61 = vpack.c.bf16 %v2117_v57, %v2116_v60 }
 0x5f6   :  { %v1530_v44 = vsel %vm673_vm9, %v2141_v18, 0.0  ;;  %v2143_v45 = vpop.eup %2142 }
 0x5f7   :  { %1531 = vadd.xlane.f32.xlu1 %v1530_v44  ;;  %2064 = vmatprep.subr.bf16.mxu0 %v2063_v61 }
 0x5f9   :  { %v2145_v63 = vpop.eup %2144 }
 0x635   :  { %v1962_v62 = vpop.f32.mrb[10].mxu0 }
 0x636   :  { %v1340_v0 = vmul.f32 %v2143_v45, %v1962_v62  ;;  %v1328_v1 = vpop.f32.mrb[11].mxu0 }
 0x637   :  { %v1339_v56 = vmul.f32 %v2145_v63, %v1328_v1 }
 0x639   :  { %1965 = vmatprep.mubr.msk.f32.mxu0 %vm585_vm1, %v1339_v56 }
 0x63a   :  { %1966 = vmatmul.mubr.msk.f32.vlgmr.msra.gmra.mrb[8].mxu0 %vm585_vm1, %v1340_v0 }
 0x63b   :  { %2066 = vmatpush3.bf16.msra.mxu0 %v2063_v61  ;;  %1979 = vmatprep.mubr.msk.f32.mxu0 %vm673_vm9, %v2139_v55 }
 0x63c   :  { %1982 = vmatprep.subr.mxu0 %v584_v2 }
 0x63e   :  { %1980 = vmatmul.mubr.msk.f32.vlgmr.msra.gmra.mrb[12].mxu0 %vm673_vm9, %v2141_v18 }
 0x63f   :  { %1983 = vmatpush3.msra.mxu0 %v584_v2 }
 0x680   :  { %v1529_v3 = vpop.xlane.xlu0 %1528 }
 0x681   :  { %2146 = vrcp.f32 %v1529_v3 }
 0x684   :  { %v1532_v4 = vpop.xlane.xlu1 %1531 }
 0x685   :  { %2148 = vrcp.f32 %v1532_v4 }
 0x68b   :  { %v2147_v6 = vpop.eup %2146 }
 0x68f   :  { %v2149_v8 = vpop.eup %2148 }
 0x711   :  { %v1981_v5 = vpop.f32.mrb[12].mxu0 }
 0x712   :  { %v1611_v7 = vpop.f32.mrb[13].mxu0  ;;  %v1623_v11 = vmul.f32 %v2149_v8, %v1981_v5 }
 0x713   :  { %v1622_v9 = vmul.f32 %v2147_v6, %v1611_v7 }
 0x715   :  { %1984 = vmatprep.mubr.msk.f32.mxu0 %vm585_vm1, %v1622_v9 }
 0x716   :  { %1985 = vmatmul.mubr.msk.f32.vlgmr.msra.gmra.mrb[8].mxu0 %vm585_vm1, %v1623_v11 }
 0x7e9   :  { %v1986_v14 = vpop.f32.mrb[8].mxu0 }
 0x7ea   :  { %v1715_v15 = vadd.f32 %v1986_v14, %v1781_v13  ;;  %v1696_v16 = vpop.f32.mrb[9].mxu0 }
 0x7eb   :  { %v1714_v17 = vadd.f32 %v1781_v13, %v1696_v16 }
 0x7ec   :  { %1717 = vst.msk [vmem:[#allocation16 + $0x8] sm:$0xff] %vm171_vm0, %v1715_v15 }
 0x7ed   :  { %1716 = vst.msk [vmem:[#allocation16] sm:$0xff] %vm171_vm0, %v1714_v17 }
 0x7ee   :  { %2337 = shalt.err (!%p2334_p12)
}
 0x7ef   :  { %s2338_s17 = scalar_lea.hbm %s2752_s10, 256 }
 0x7f0   :  { %p2339_p13 = scmp.ne.s32.totalorder %s2752_s10, %s2338_s17  ;;  %p2342_p0 = scmp.lt.u32.totalorder %s2338_s17, %s2752_s10 }
 0x7f2   :  { %p2344_p1 = pnand %p2342_p0, %p2339_p13 }
 0x7f4   :  { %2347 = shalt.err (!%p2344_p1)
}
 0x7f5   :  { %1729 = dma.vmem_to_hbm [thread:$0]  %s1724_s5, 256, %s2752_s10, [#allocation4], %s2362_s25, %s2362_s25, %s2363_s26  }
 0x7f6   :  { %2358 = dma.done.wait [#allocation4], 256  }
 0x7f7   :  { %2359 = vsyncadd [#allocation4], 4294967040 }
 0x7f8   :  { %1733 = vsyncpa [#allocation3], 1 }
 0x7f9   :  { %1734 = vsyncpa [#allocation6], 1 }
 0x7fa   :  { %1735 = vsyncpa [#allocation9], 1 }
 0x7fb   :  { %1736 = vsyncpa [#allocation12], 1 }
 0x7fc   :  { %1737 = vsyncpa [#allocation15], 1 }
 0x7fd   :  { %1738 = vsyncpa [#allocation4], 1 }

</bundles_post_ra>
